<compile_context>
chip_gen: v6e
topology: v6e:2x2x1
jax: 0.10.0
libtpu: 0.0.40
codegen_flags: <defaults>
</compile_context>

<pallas_src>
import functools

import numpy as np
import jax
import jax.numpy as jnp
from jax.experimental import pallas as pl
from jax.experimental.pallas import tpu as pltpu

BN_EPS = 1e-5


# ---------------------------------------------------------------------------
# Kernel 1: both lin_A applications on A + the V path (bias, ReLU), fused.
# ---------------------------------------------------------------------------
def _pool_kernel(a_ref, v_ref, wblk_ref, w_ref, c_col_ref, bias2_ref,
                 outA_ref, outV_ref, *, TB, N, L, N1, apply_relu):
    # a_ref    : (TB, N, L*N)    A[b, n, l*N + m]   (natural layout, free reshape)
    # v_ref    : (TB, N, F)      V[b, n, f]         (natural layout)
    # wblk_ref : (L*N, L*N1)     kron(I_L, W^T): [(l',m),(l,q)] = d_{l,l'} W[q,m]
    # w_ref    : (N1, N)         W
    # c_col_ref: (N1, 1)         lin_A bias as a column (broadcasts over F lanes)
    # bias2_ref: (L*N1, N1)      folded bias of both lin_A applications:
    #                            [l*N1+q, p] = c[q]*sum_n W[p,n] + c[p]
    # outA_ref : (TB, L*N1, N1)  == rA5[b, l*N1+q, p]  (exact PyTorch flat order)
    # outV_ref : (TB, N1, F)     relu(lin_A(V^T))^T, pre-BatchNorm, final layout
    w = w_ref[...]
    c_col = c_col_ref[...]
    bias2 = bias2_ref[...]

    # ---- contraction #1 (over A's last node axis m), whole batch block ----
    # u[(b, n), l*N1+q] = sum_m A[b, n, l, m] * W[q, m]
    a = a_ref[...].reshape(TB * N, L * N)              # merge leading dims (free)
    u = jnp.dot(a, wblk_ref[...], preferred_element_type=jnp.float32)
    u = u.reshape(TB, N, L * N1)                       # split leading dim (free)

    for tb in range(TB):                               # static, small batch block
        # ---- contraction #2 (over the first node axis n), fused over (l, q) ----
        # r[p, l*N1+q] = sum_n W[p, n] * u[tb, n, l*N1+q]
        r = jnp.dot(w, u[tb], preferred_element_type=jnp.float32)   # (N1, L*N1)
        # PyTorch's .view chain needs flat order (l, q, p): small in-VMEM
        # transpose (XLU slot) + the folded bias of both Linear applications.
        outA_ref[tb] = r.T + bias2                                   # (L*N1, N1)

        # ---- V path: lin_A(V^T) emitted directly as (N1, F) ----
        yv = jnp.dot(w, v_ref[tb], preferred_element_type=jnp.float32) + c_col
        if apply_relu:
            yv = jnp.maximum(yv, 0.0)
        outV_ref[tb] = yv


# ---------------------------------------------------------------------------
# Kernel 2: train-mode BatchNorm1d over channels F, gridded over channel tiles.
# ---------------------------------------------------------------------------
def _bn_kernel(x_ref, g_ref, b_ref, o_ref):
    # x: (B, N1, TF), channels F on the lane axis; stats over (batch, node)
    # = axes (0, 1) -> pure per-lane VPU reductions.  Shifted two-pass variance.
    x = x_ref[...]
    inv_cnt = 1.0 / (x.shape[0] * x.shape[1])
    mean = jnp.sum(x, axis=(0, 1), keepdims=True) * inv_cnt
    d = x - mean
    var = jnp.sum(d * d, axis=(0, 1), keepdims=True) * inv_cnt
    scale = jax.lax.rsqrt(var + BN_EPS) * g_ref[...][None]          # (1, 1, TF)
    o_ref[...] = d * scale + b_ref[...][None]


def _pick_batch_block(B, per_batch_bytes, budget_bytes=4 << 20):
    """Batch-block size: amortize per-grid-step overhead (v5e/v6e) while keeping
    >= 2 parallel steps (v7x has 2 TensorCores) and a small VMEM footprint."""
    if B <= 1:
        return 1
    tb = max(1, min(B // 2, budget_bytes // max(per_batch_bytes, 1)))
    while B % tb:
        tb -= 1
    return max(tb, 1)


def global_average_pooling_sym_max(A, V, W, c, gamma=None, beta=None, *,
                                   is_relu=True, is_bn=True, batch_block=None):
    B, N, L, N2 = A.shape
    assert N2 == N, "last two node axes of A must both equal input_nodes_V"
    F = V.shape[-1]
    N1 = W.shape[0]

    A = A.astype(jnp.float32)
    V = V.astype(jnp.float32)
    W = W.astype(jnp.float32)
    c = c.astype(jnp.float32)

    # ---- free (bitcast) wrapper reshape: natural HBM layout, no copy ----
    a3 = A.reshape(B, N, L * N)                                   # [b, n, l*N+m]

    # ---- tiny host-side weight prep (built once) ----
    wblk = jnp.kron(jnp.eye(L, dtype=jnp.float32), W.T)          # (L*N, L*N1)
    S = jnp.sum(W, axis=1)                                        # S[p] = sum_n W[p,n]
    bias2 = jnp.tile(c[:, None] * S[None, :] + c[None, :], (L, 1))   # (L*N1, N1)
    c_col = c.reshape(N1, 1)

    per_batch_bytes = 4 * (N * L * N + N * F + 2 * N * L * N1 + L * N1 * N1 + N1 * F)
    TB = batch_block if batch_block is not None else _pick_batch_block(B, per_batch_bytes)
    assert B % TB == 0
    # TODO(synk): for very large N*L (A block >> a few MiB) add a row-tiling
    # grid axis / explicit vmem_limit_bytes; unnecessary at graph-pooling sizes.

    kern = functools.partial(_pool_kernel, TB=TB, N=N, L=L, N1=N1,
                             apply_relu=is_relu)
    outA_raw, outV_pre = pl.pallas_call(
        kern,
        grid=(B // TB,),
        out_shape=(jax.ShapeDtypeStruct((B, L * N1, N1), jnp.float32),
                   jax.ShapeDtypeStruct((B, N1, F), jnp.float32)),
        in_specs=[pl.BlockSpec((TB, N, L * N), lambda i: (i, 0, 0)),
                  pl.BlockSpec((TB, N, F), lambda i: (i, 0, 0)),
                  pl.BlockSpec((L * N, L * N1), lambda i: (0, 0)),
                  pl.BlockSpec((N1, N), lambda i: (0, 0)),
                  pl.BlockSpec((N1, 1), lambda i: (0, 0)),
                  pl.BlockSpec((L * N1, N1), lambda i: (0, 0))],
        out_specs=(pl.BlockSpec((TB, L * N1, N1), lambda i: (i, 0, 0)),
                   pl.BlockSpec((TB, N1, F), lambda i: (i, 0, 0))),
        compiler_params=pltpu.CompilerParams(
            dimension_semantics=("parallel",)),
    )(a3, V, wblk, W, c_col, bias2)

    # outA_raw[b, l*N1+q, p] matches the flat order of the module's contiguous
    # (B, L*N1, N1) tensor, so this reshape reproduces .view(B, N1, L, N1).
    result_A = outA_raw.reshape(B, N1, L, N1)

    if is_bn:
        if gamma is None:
            gamma = jnp.ones((F,), jnp.float32)
        if beta is None:
            beta = jnp.zeros((F,), jnp.float32)
        TF = 128 if (F % 128 == 0) else F
        result_V = pl.pallas_call(
            _bn_kernel,
            grid=(F // TF,),
            out_shape=jax.ShapeDtypeStruct((B, N1, F), jnp.float32),
            in_specs=[pl.BlockSpec((B, N1, TF), lambda j: (0, 0, j)),
                      pl.BlockSpec((1, TF), lambda j: (0, j)),
                      pl.BlockSpec((1, TF), lambda j: (0, j))],
            out_specs=pl.BlockSpec((B, N1, TF), lambda j: (0, 0, j)),
            compiler_params=pltpu.CompilerParams(
                dimension_semantics=("parallel",)),
        )(outV_pre,
          gamma.reshape(1, F).astype(jnp.float32),
          beta.reshape(1, F).astype(jnp.float32))
        # TODO(synk): BatchNorm running_mean/running_var momentum state is not
        # updated (train-mode forward outputs do not depend on it).
    else:
        result_V = outV_pre
    return result_A, result_V


def reference_forward(A, V, W, c, gamma, beta, *, is_relu=True, is_bn=True):
    """Direct pure-JAX transcription of the PyTorch forward (train-mode BN)."""
    B, N, L, _ = A.shape
    F = V.shape[-1]
    N1 = W.shape[0]
    hi = jax.lax.Precision.HIGHEST
    lin = lambda t: jnp.matmul(t, W.T, precision=hi) + c
    rA = lin(A.reshape(B, -1, N).astype(jnp.float32))   # (B, N*L, N1)
    rA = rA.reshape(B, N, -1)                            # (B, N, L*N1)
    rA = jnp.swapaxes(rA, 1, 2)                          # (B, L*N1, N)
    rA = lin(rA)                                         # (B, L*N1, N1)
    rA = rA.reshape(B, N1, L, N1)
    rV = lin(jnp.swapaxes(V, 1, 2))                      # (B, F, N1)
    rV = jnp.swapaxes(rV, 1, 2)                          # (B, N1, F)
    if is_relu:
        rV = jnp.maximum(rV, 0.0)
    if is_bn:
        t = jnp.swapaxes(rV, 1, 2)                       # (B, F, N1), channels = F
        mean = t.mean(axis=(0, 2), keepdims=True)
        var = ((t - mean) ** 2).mean(axis=(0, 2), keepdims=True)
        t = (t - mean) / jnp.sqrt(var + BN_EPS) * gamma.reshape(1, F, 1) \
            + beta.reshape(1, F, 1)
        rV = jnp.swapaxes(t, 1, 2)
    return rA, rV


if __name__ == "__main__":
    # B graphs, N nodes (= input_nodes_V), L = no_A adjacency channels,
    # F = input_features_V, N1 = output_features_V.
    B, N, L, F, N1 = 2, 8, 2, 16, 8
    key = jax.random.PRNGKey(0)
    kA, kV, kW = jax.random.split(key, 3)

    # A left general (not symmetrized): the kernel reproduces the exact PyTorch
    # index plumbing for arbitrary A, which makes this a stricter check.
    A = jax.random.normal(kA, (B, N, L, N), jnp.float32)
    V = jax.random.normal(kV, (B, N, F), jnp.float32)

    # lin_A.weight ~ N(0, 1/sqrt(input_features_V)), lin_A.bias = 0.1,
    # BatchNorm1d(F): weight=1, bias=0 (train-mode batch statistics).
    W = (1.0 / F ** 0.5) * jax.random.normal(kW, (N1, N), jnp.float32)
    c = jnp.full((N1,), 0.1, jnp.float32)
    gamma = jnp.ones((F,), jnp.float32)
    beta = jnp.zeros((F,), jnp.float32)

    rA, rV = global_average_pooling_sym_max(A, V, W, c, gamma, beta)
    jax.block_until_ready((rA, rV))

    rA_ref, rV_ref = reference_forward(A, V, W, c, gamma, beta)
    np.testing.assert_allclose(np.asarray(rA), np.asarray(rA_ref), rtol=2e-3, atol=2e-3)
    np.testing.assert_allclose(np.asarray(rV), np.asarray(rV_ref), rtol=2e-3, atol=2e-3)

    print("KERNEL_OK")
</pallas_src>

<mosaic_0001>
module attributes {stable_mosaic.version = 11 : i64} {
  func.func @_pool_kernel(%arg0: i32, %arg1: memref<1x8x16xf32, #tpu.memory_space<vmem>>, %arg2: memref<1x8x16xf32, #tpu.memory_space<vmem>>, %arg3: memref<16x16xf32, #tpu.memory_space<vmem>>, %arg4: memref<8x8xf32, #tpu.memory_space<vmem>>, %arg5: memref<8x1xf32, #tpu.memory_space<vmem>>, %arg6: memref<16x8xf32, #tpu.memory_space<vmem>>, %arg7: memref<1x16x8xf32, #tpu.memory_space<vmem>>, %arg8: memref<1x8x16xf32, #tpu.memory_space<vmem>>) attributes {dimension_semantics = [#tpu.dimension_semantics<parallel>], iteration_bounds = array<i64: 2>, scalar_prefetch = 0 : i64, scratch_operands = 0 : i64, tpu.core_type = #tpu.core_type<tc>, window_params = [{transform_indices = @transform_0, window_bounds = array<i64: 1, 8, 16>}, {transform_indices = @transform_1, window_bounds = array<i64: 1, 8, 16>}, {pipeline_mode = #tpu.pipeline_mode<synchronous>, transform_indices = @transform_2, window_bounds = array<i64: 16, 16>}, {pipeline_mode = #tpu.pipeline_mode<synchronous>, transform_indices = @transform_3, window_bounds = array<i64: 8, 8>}, {pipeline_mode = #tpu.pipeline_mode<synchronous>, transform_indices = @transform_4, window_bounds = array<i64: 8, 1>}, {pipeline_mode = #tpu.pipeline_mode<synchronous>, transform_indices = @transform_5, window_bounds = array<i64: 16, 8>}, {transform_indices = @transform_6, window_bounds = array<i64: 1, 16, 8>}, {transform_indices = @transform_7, window_bounds = array<i64: 1, 8, 16>}]} {
    %c0 = arith.constant 0 : index
    %c0_0 = arith.constant 0 : index
    %0 = vector.load %arg4[%c0, %c0_0] : memref<8x8xf32, #tpu.memory_space<vmem>>, vector<8x8xf32>
    %c0_1 = arith.constant 0 : index
    %c0_2 = arith.constant 0 : index
    %1 = vector.load %arg5[%c0_1, %c0_2] : memref<8x1xf32, #tpu.memory_space<vmem>>, vector<8x1xf32>
    %c0_3 = arith.constant 0 : index
    %c0_4 = arith.constant 0 : index
    %2 = vector.load %arg6[%c0_3, %c0_4] : memref<16x8xf32, #tpu.memory_space<vmem>>, vector<16x8xf32>
    %c0_5 = arith.constant 0 : index
    %c0_6 = arith.constant 0 : index
    %c0_7 = arith.constant 0 : index
    %3 = vector.load %arg1[%c0_5, %c0_6, %c0_7] : memref<1x8x16xf32, #tpu.memory_space<vmem>>, vector<1x8x16xf32>
    %4 = vector.shape_cast %3 : vector<1x8x16xf32> to vector<8x16xf32>
    %c0_8 = arith.constant 0 : index
    %c0_9 = arith.constant 0 : index
    %5 = vector.load %arg3[%c0_8, %c0_9] : memref<16x16xf32, #tpu.memory_space<vmem>>, vector<16x16xf32>
    %cst = arith.constant dense<0.000000e+00> : vector<8x16xf32>
    %6 = tpu.matmul %4, %5, %cst {dimension_numbers = #tpu.dot_dimension_numbers<[1], [0], [0], [1], [0, 0, 1, 1], [], []>} : vector<8x16xf32>, vector<16x16xf32>, vector<8x16xf32> -> vector<8x16xf32>
    %7 = vector.shape_cast %6 : vector<8x16xf32> to vector<1x8x16xf32>
    %8 = vector.shape_cast %7 : vector<1x8x16xf32> to vector<8x16xf32>
    %cst_10 = arith.constant dense<0.000000e+00> : vector<8x16xf32>
    %9 = tpu.matmul %0, %8, %cst_10 {dimension_numbers = #tpu.dot_dimension_numbers<[1], [0], [0], [1], [0, 0, 1, 1], [], []>} : vector<8x8xf32>, vector<8x16xf32>, vector<8x16xf32> -> vector<8x16xf32>
    %10 = tpu.transpose %9, [1, 0] : vector<8x16xf32> -> vector<16x8xf32>
    %11 = arith.addf %10, %2 : vector<16x8xf32>
    %c0_11 = arith.constant 0 : index
    %c0_12 = arith.constant 0 : index
    %c0_13 = arith.constant 0 : index
    %12 = vector.load %arg7[%c0_11, %c0_12, %c0_13] : memref<1x16x8xf32, #tpu.memory_space<vmem>>, vector<1x16x8xf32>
    %13 = vector.shape_cast %12 : vector<1x16x8xf32> to vector<16x8xf32>
    %14 = vector.shape_cast %11 : vector<16x8xf32> to vector<1x16x8xf32>
    tpu.vector_store %arg7[%c0_11, %c0_12, %c0_13], %14 {strides = array<i32>} : memref<1x16x8xf32, #tpu.memory_space<vmem>>, vector<1x16x8xf32>,
    %c0_14 = arith.constant 0 : index
    %c0_15 = arith.constant 0 : index
    %c0_16 = arith.constant 0 : index
    %15 = vector.load %arg2[%c0_14, %c0_15, %c0_16] : memref<1x8x16xf32, #tpu.memory_space<vmem>>, vector<1x8x16xf32>
    %16 = vector.shape_cast %15 : vector<1x8x16xf32> to vector<8x16xf32>
    %cst_17 = arith.constant dense<0.000000e+00> : vector<8x16xf32>
    %17 = tpu.matmul %0, %16, %cst_17 {dimension_numbers = #tpu.dot_dimension_numbers<[1], [0], [0], [1], [0, 0, 1, 1], [], []>} : vector<8x8xf32>, vector<8x16xf32>, vector<8x16xf32> -> vector<8x16xf32>
    %18 = vector.broadcast %1 : vector<8x1xf32> to vector<8x16xf32>
    %19 = arith.addf %17, %18 : vector<8x16xf32>
    %cst_18 = arith.constant 0.000000e+00 : f32
    %20 = vector.broadcast %cst_18 : f32 to vector<8x16xf32>
    %21 = arith.maximumf %19, %20 : vector<8x16xf32>
    %c0_19 = arith.constant 0 : index
    %c0_20 = arith.constant 0 : index
    %c0_21 = arith.constant 0 : index
    %22 = vector.load %arg8[%c0_19, %c0_20, %c0_21] : memref<1x8x16xf32, #tpu.memory_space<vmem>>, vector<1x8x16xf32>
    %23 = vector.shape_cast %22 : vector<1x8x16xf32> to vector<8x16xf32>
    %24 = vector.shape_cast %21 : vector<8x16xf32> to vector<1x8x16xf32>
    tpu.vector_store %arg8[%c0_19, %c0_20, %c0_21], %24 {strides = array<i32>} : memref<1x8x16xf32, #tpu.memory_space<vmem>>, vector<1x8x16xf32>,
    return
  }
  func.func @transform_0(%arg0: i32) -> (i32, i32, i32) {
    %c0_i32 = arith.constant 0 : i32
    %c0_i32_0 = arith.constant 0 : i32
    %c0_i32_1 = arith.constant 0 : i32
    return %arg0, %c0_i32, %c0_i32_0 : i32, i32, i32
  }
  func.func @transform_1(%arg0: i32) -> (i32, i32, i32) {
    %c0_i32 = arith.constant 0 : i32
    %c0_i32_0 = arith.constant 0 : i32
    %c0_i32_1 = arith.constant 0 : i32
    return %arg0, %c0_i32, %c0_i32_0 : i32, i32, i32
  }
  func.func @transform_2(%arg0: i32) -> (i32, i32) {
    %c0_i32 = arith.constant 0 : i32
    %c0_i32_0 = arith.constant 0 : i32
    %c0_i32_1 = arith.constant 0 : i32
    return %c0_i32, %c0_i32_0 : i32, i32
  }
  func.func @transform_3(%arg0: i32) -> (i32, i32) {
    %c0_i32 = arith.constant 0 : i32
    %c0_i32_0 = arith.constant 0 : i32
    %c0_i32_1 = arith.constant 0 : i32
    return %c0_i32, %c0_i32_0 : i32, i32
  }
  func.func @transform_4(%arg0: i32) -> (i32, i32) {
    %c0_i32 = arith.constant 0 : i32
    %c0_i32_0 = arith.constant 0 : i32
    %c0_i32_1 = arith.constant 0 : i32
    return %c0_i32, %c0_i32_0 : i32, i32
  }
  func.func @transform_5(%arg0: i32) -> (i32, i32) {
    %c0_i32 = arith.constant 0 : i32
    %c0_i32_0 = arith.constant 0 : i32
    %c0_i32_1 = arith.constant 0 : i32
    return %c0_i32, %c0_i32_0 : i32, i32
  }
  func.func @transform_6(%arg0: i32) -> (i32, i32, i32) {
    %c0_i32 = arith.constant 0 : i32
    %c0_i32_0 = arith.constant 0 : i32
    %c0_i32_1 = arith.constant 0 : i32
    return %arg0, %c0_i32, %c0_i32_0 : i32, i32, i32
  }
  func.func @transform_7(%arg0: i32) -> (i32, i32, i32) {
    %c0_i32 = arith.constant 0 : i32
    %c0_i32_0 = arith.constant 0 : i32
    %c0_i32_1 = arith.constant 0 : i32
    return %arg0, %c0_i32, %c0_i32_0 : i32, i32, i32
  }
}

</mosaic_0001>

<bundles_post_ra>
// kernel: tpu_custom_call.1
= control target key start
LH: loop header
LB: loop body
LE: loop exit
PB: predicated region body
PF: predicated region fallthrough
CT: control target
= control target key end

     0   :  { %13 = vsyncpa [#allocation3], 0  ;;  %s1178_s0 = inlined_call_operand.vmem [shape: f32[2,8,16], index: 0, kind: input, shape index: {}]   ;;  %s1179_s1 = inlined_call_operand.vmem [shape: f32[2,8,16], index: 1, kind: input, shape index: {}]   ;;  %s1180_s2 = inlined_call_operand.hbm [shape: f32[16,16], index: 2, kind: input, shape index: {}]   ;;  %s1181_s3 = inlined_call_operand.hbm [shape: f32[8,8], index: 3, kind: input, shape index: {}]   ;;  %s1182_s4 = inlined_call_operand.vmem [shape: f32[8,1], index: 4, kind: input, shape index: {}]   ;;  %s1183_s5 = inlined_call_operand.vmem [shape: f32[16,8], index: 5, kind: input, shape index: {}]   ;;  %s1184_s6 = inlined_call_operand.vmem [shape: f32[2,16,8], index: 6, kind: output, shape index: {0}]   ;;  %s1185_s7 = inlined_call_operand.hbm [shape: f32[2,8,16], index: 7, kind: output, shape index: {1}]  }
   0x1   :  { %14 = vsyncpa [#allocation6], 0 }
   0x2   :  { %15 = vsyncpa [#allocation4], 0 }
   0x3   :  { %17 = vsyncpa [#allocation4 + $0x1], 0  ;;  %s1022_s24 = smov 0   ;;  %s1024_s25 = smov 0  }
   0x4   :  { %s1026_s26 = smov 0   ;;  %s1028_s27 = smov 0  }
   0x5 LB: > { %s1043_s28 = sadd.s32 4294967295, %s972_s27   ;;  %s741_s29 = sadd.s32 4294967294, %s972_s27   ;;  %s972_s27 = sphi %s1028_s27, %s1199_s27   ;;  %s968_s26 = sphi %s1026_s26, %s1198_s26   ;;  %s964_s25 = sphi %s1024_s25, %s1197_s25   ;;  %s960_s24 = sphi %s1022_s24, %s1196_s24  }
   0x6   : > { %s1047_s30 = sadd.s32 1, %s972_s27   ;;  %s192_s8 = sadd.s32 1, %s968_s26 }
   0x7   : > { %s189_s9 = ssub.s32 %s972_s27, %s1047_s30  ;;  %p202_p0 = scmp.ne.s32.totalorder %s968_s26, %s964_s25 }
   0x8   : > { %p190_p1 = scmp.eq.s32.totalorder %s189_s9, 0  ;;  %p203_p2 = scmp.eq.s32.totalorder %s1043_s28, 1 }
   0x9   : > { %p208_p3 = scmp.ne.s32.totalorder %s964_s25, %s960_s24  ;;  %p209_p4 = scmp.eq.s32.totalorder %s741_s29, 1 }
   0xa   : > { %s1058_s10 = scalar_select %p190_p1, %s968_s26, %s192_s8  }
   0xb   : > { %p1060_p5 = por %p203_p2, %p202_p0  ;;  %p1064_p6 = por %p209_p4, %p208_p3 }
   0xc   : > { %p742_p7 = scmp.ge.s32.totalorder %s972_s27, 1  ;;  %p216_p8 = scmp.lt.s32.totalorder %s972_s27, 3 }
   0xd   : > { %s1188_s12 = scalar_select %p1064_p6, 1, 0 }
   0xe   : > { %p1186_p9 = scmp.eq.s32.totalorder %s1043_s28, 0  ;;  %p1071_p10 = pnand %p742_p7, %p216_p8 }
   0xf   : > { %s974_s14 = smov [#allocation2]   ;;  %s975_s17 = smov [#allocation5]  }
  0x10   : > { %s228_s15 = sshll.u32 %s974_s14, 4  ;;  %p796_p11 = pneg %p1071_p10  ;;  %s229_s15 = int_to_ptr.vmem [resolvable:$true] %s228_s15 }
  0x11   : > { %s242_s18 = sshll.u32 %s975_s17, 4  ;;  %s863_s19 = scalar_lea.vmem %s229_s15, 256  ;;  %s243_s18 = int_to_ptr.vmem [resolvable:$true] %s242_s18 }
  0x12   : > { %p1079_p12 = pnand %p1186_p9, %p796_p11  ;;  %p864_p0 = scmp.ne.s32.totalorder %s229_s15, %s863_s19 }
  0x13   : > { %p871_p3 = scmp.lt.s32.totalorder %s229_s15, %s229_s15  ;;  %p872_p4 = scmp.lt.s32.totalorder %s863_s19, %s863_s19 }
  0x14   : > { %p854_p13 = pneg %p1079_p12 }
  0x15   : > { %p873_p7 = por %p872_p4, %p871_p3 }
  0x16   : > { %p866_p1 = pnand %p864_p0, %p854_p13 }
  0x18   : > { %p867_p2 = pneg %p866_p1 }
  0x1a   : > { %p874_p8 = pnand %p873_p7, %p867_p2 }
  0x1c   : > { %877 = shalt.err (!%p874_p8)
}
  0x1d   : > { %s976_s20 = smov 128   ;;  %s977_s21 = smov 8  }
  0x1e   : > { %799 = dma.hbm_to_vmem [thread:$0]  (!%p1079_p12), %s1180_s2, 256, %s229_s15, [#allocation3], %s976_s20, %s976_s20, %s977_s21  }
  0x1f   : > { %s889_s29 = scalar_lea.vmem %s243_s18, 128  ;;  %p897_p9 = scmp.lt.s32.totalorder %s243_s18, %s243_s18 }
  0x20   : > { %p890_p11 = scmp.ne.s32.totalorder %s243_s18, %s889_s29  ;;  %p898_p6 = scmp.lt.s32.totalorder %s889_s29, %s889_s29 }
  0x22   : > { %p892_p0 = pnand %p890_p11, %p854_p13  ;;  %p899_p3 = por %p898_p6, %p897_p9 }
  0x24   : > { %p893_p1 = pneg %p892_p0 }
  0x26   : > { %p900_p2 = pnand %p899_p3, %p893_p1 }
  0x28   : > { %903 = shalt.err (!%p900_p2)
}
  0x29   : > { %802 = dma.hbm_to_vmem [thread:$0]  (!%p1079_p12), %s1181_s3, 128, %s243_s18, [#allocation6]  }
  0x2a   : > { %275 = sbr.rel (%p1071_p10) target bundleno = 577 (0x241), region = 44  ;;  %p1191_p4 = scmp.eq.s32.totalorder (!%p1071_p10), %s1043_s28, 0 }
  0x2f   : > { %947 = dma.done.wait (%p1191_p4), [#allocation3], 256   ;;  %p1192_p13 = pmov %p1191_p4 }
  0x30   : > { %p1193_p7 = pmov %p1191_p4 }
  0x31   : > { %949 = vsyncadd (%p1192_p13), [#allocation3], 4294967040 }
  0x32   : > { %951 = dma.done.wait (%p1193_p7), [#allocation6], 128   ;;  %p1194_p6 = pmov %p1191_p4 }
  0x33   : > { %p319_p9 = scmp.lt.s32.totalorder %s1043_s28, 1  ;;  %v978_v0 = vmov 0.0   ;;  %vm979_vm0 = vmmov 0   ;;  %v338_v1 = vld [vmem:[#allocation2 + $0x8] sm:$0xff]  ;;  %v337_v2 = vld [vmem:[#allocation2] sm:$0xff]  ;;  %vm339_vm1 = vcmask 130048  }
  0x34   : > { %953 = vsyncadd (%p1194_p6), [#allocation6], 4294967168  ;;  %769 = vmatprep.subr.mxu0 %v978_v0  ;;  %773 = vmatprep.mubr.msk.f32.mxu0 %vm979_vm0, %v978_v0  ;;  %v333_v4 = vld [vmem:[%s1182_s4] sm:$0xff]  ;;  %v980_v5 = vmov 0   ;;  %v332_v6 = vld [vmem:[#allocation5] sm:$0xff]  ;;  %vm413_vm2 = vcmask 64512  }
  0x35   : > { %s1114_s13 = scalar_select %p319_p9, %s1043_s28, 1  ;;  %776 = vmatprep.subr.mxu1 %v978_v0  ;;  %778 = vmatprep.mubr.msk.f32.mxu1 %vm979_vm0, %v978_v0 }
  0x36   : > { %770 = vmatpush3.msra.mxu0 %v338_v1  ;;  %851 = vset.pattern.permute.xlu0 %v980_v5  ;;  %s316_s23 = sand.u32 1, %s964_s25   ;;  %s758_s8 = sshll.u32 %s1043_s28, 7 }
  0x37   : > { %s750_s14 = sshll.u32 %s1114_s13, 3  ;;  %771 = vmatprep.subr.mxu0 %v978_v0  ;;  %526 = vperm.xlu0 %851, %v333_v4   ;;  %s749_s29 = sshll.u32 %s316_s23, 3 }
  0x38   : > { %s322_s17 = scalar_lea.vmem %s1178_s0, %s750_s14  ;;  %772 = vmatpush3.msra.mxu0 %v337_v2  ;;  %s326_s22 = scalar_lea.vmem %s1179_s1, %s750_s14 }
  0x39   : > { %v336_v3 = vld [vmem:[%s322_s17] sm:$0xff]  ;;  %s318_s9 = scalar_lea.vmem [#allocation7], %s749_s29  ;;  %s621_s17 = scalar_lea.hbm %s1185_s7, %s758_s8 }
  0x3a   : > { %774 = vmatmul.mubr.msk.f32.vlgmr.msra.gmra.mxu0 %vm339_vm1, %v336_v3  ;;  %v523_v8 = vld [vmem:[%s326_s22] sm:$0xff]  ;;  %s623_s14 = sshll.u32 %s318_s9, 4  ;;  %s607_s18 = scalar_lea.sflag [#allocation4], %s316_s23  ;;  %s624_s14 = int_to_ptr.vmem [resolvable:$true] %s623_s14 }
  0x3b   : > { %s904_s19 = scalar_lea.vmem %s624_s14, 128  ;;  %s981_s20 = smov [#allocation7]  }
  0x3c   : > { %p905_p10 = scmp.ne.s32.totalorder %s624_s14, %s904_s19  ;;  %s908_s28 = sshll.u32 %s981_s20, 4  ;;  %s909_s28 = int_to_ptr.vmem [resolvable:$false] %s908_s28 }
  0x3d   : > { %s910_s21 = scalar_lea.vmem %s909_s28, 256  ;;  %p911_p11 = scmp.lt.s32.totalorder %s624_s14, %s909_s28 }
  0x3e   : > { %p906_p12 = pnand %p905_p10, %p1060_p5  ;;  %p912_p0 = scmp.lt.s32.totalorder %s910_s21, %s904_s19 }
  0x40   : > { %p907_p8 = pneg %p906_p12  ;;  %p913_p1 = por %p912_p0, %p911_p11 }
  0x42   : > { %p914_p3 = pnand %p913_p1, %p907_p8 }
  0xb2   : > { %v527_v12 = vpop.permute.xlu0 %526 }
  0xfa   : > { %v409_v7 = vpop.f32.mrf.mxu0 }
  0xfb   : > { %777 = vmatpush3.msra.mxu1 %v409_v7 }
  0xfc   : > { %v775_v9 = vpop.f32.mrf.mxu0  ;;  %779 = vmatmul.mubr.msk.f32.vlgmr.msra.gmra.mxu1 %vm413_vm2, %v332_v6  ;;  %781 = vmatprep.subr.mxu1 %v978_v0 }
  0xfd   : > { %782 = vmatpush3.msra.mxu1 %v523_v8  ;;  %783 = vmatprep.mubr.msk.f32.mxu1 %vm979_vm0, %v978_v0 }
 0x100   : > { %784 = vmatmul.mubr.msk.f32.vlgmr.msra.gmra.mxu1 %vm413_vm2, %v332_v6 }
 0x1bc   : > { %v483_v10 = vpop.f32.mrf.mxu1 }
 0x1bd   : > { %487 = vxpose.xlu0.b32.start.end [1/1] (short) (narrow) %v483_v10, 16 }
 0x1be   : > { %v780_v11 = vpop.f32.mrf.mxu1 }
 0x1c0   : > { %v595_v13 = vpop.f32.mrf.mxu1 }
 0x1c1   : > { %v596_v14 = vadd.f32 %v595_v13, %v527_v12 }
 0x1c2   : > { %v785_v15 = vpop.f32.mrf.mxu1 }
 0x1c3   : > { %v599_v16 = vmax.f32 %v596_v14, 0.0 }
 0x1c5   : > { %600 = vst.msk [vmem:[%s318_s9] sm:$0xff] %vm339_vm1, %v599_v16 }
 0x1c6   : > { %917 = shalt.err (!%p914_p3)
}
 0x1c7   : > { %s918_s22 = scalar_lea.hbm %s621_s17, 128  ;;  %s922_s8 = scalar_lea.hbm %s1185_s7, 256 }
 0x1c8   : > { %p919_p2 = scmp.ne.s32.totalorder %s621_s17, %s918_s22  ;;  %p923_p7 = scmp.lt.s32.totalorder %s621_s17, %s1185_s7 }
 0x1c9   : > { %p924_p6 = scmp.lt.s32.totalorder %s922_s8, %s918_s22 }
 0x1ca   : > { %p920_p4 = pnand %p919_p2, %p1060_p5 }
 0x1cb   : > { %p925_p9 = por %p924_p6, %p923_p7 }
 0x1cc   : > { %p921_p13 = pneg %p920_p4 }
 0x1ce   : > { %p926_p10 = pnand %p925_p9, %p921_p13 }
 0x1d0   : > { %929 = shalt.err (!%p926_p10)
}
 0x1d1   : > { %794 = dma.vmem_to_hbm [thread:$0]  (%p1060_p5), %s624_s14, 128, %s621_s17, %s607_s18   ;;  %v334_v17 = vld [vmem:[%s1183_s5] sm:$0xff]  ;;  %v335_v20 = vld [vmem:[%s1183_s5 + $0x8] sm:$0xff] }
 0x1d2   : > { %s761_s16 = sshll.u32 %s1114_s13, 4 }
 0x1d3   : > { %s331_s23 = scalar_lea.vmem %s1184_s6, %s761_s16 }
 0x239   : > { %v503_v18 = vpop.trf.xlu0 }
 0x23a   : > { %v519_v19 = vadd.f32 %v503_v18, %v334_v17 }
 0x23c   : > { %521 = vst.msk [vmem:[%s331_s23] sm:$0xff] %vm413_vm2, %v519_v19 }
 0x23d   : > { %v504_v21 = vpop.trf.xlu0 }
 0x23e   : > { %v520_v22 = vadd.f32 %v504_v21, %v335_v20 }
 0x240   : > { %522 = vst.msk [vmem:[%s331_s23 + $0x8] sm:$0xff] %vm413_vm2, %v520_v22 }
 0x241 PF: > { %p811_p5 = scmp.ge.s32.totalorder %s972_s27, 2  ;;  %s643_s11 = sand.u32 1, %s960_s24  }
 0x242   : > { %p1195_p12 = scmp.ne.s32.totalorder %s1188_s12, 0  ;;  %s644_s13 = scalar_lea.sflag [#allocation4], %s643_s11 }
 0x244   : > { %p804_p8 = pnand %p811_p5, %p1195_p12 }
 0x246   : > { %p805_p11 = pneg %p804_p8 }
 0x248   : > { %955 = dma.done.wait (%p805_p11), %s644_s13, 128  }
 0x249   : > { %957 = vsyncadd (%p805_p11), %s644_s13, 4294967168  ;;  %p20_p0 = scmp.ge.s32.totalorder %s1047_s30, 4   ;;  %s1196_s24 = smov %s964_s25 }
 0x24a   : > { %s1197_s25 = smov %s968_s26  ;;  %s1198_s26 = smov %s1058_s10 }
 0x24b   : > { %s1199_s27 = smov %s1047_s30  ;;  %22 = sbr.rel (!%p20_p0) target bundleno = 5 (0x5), region = 103 }
 0x250   :  { %649 = vsyncpa [#allocation3], 1 }
 0x251   :  { %651 = vsyncpa [#allocation3 + $0x1], 1 }
 0x252   :  { %652 = vsyncpa [#allocation6], 1 }
 0x253   :  { %653 = vsyncpa [#allocation4], 1 }
 0x254   :  { %655 = vsyncpa [#allocation4 + $0x1], 1 }

</bundles_post_ra>
